<compile_context>
chip_gen: v7x
topology: tpu7x:2x2x1
jax: 0.10.0
libtpu: 0.0.40
codegen_flags: <defaults>
</compile_context>

<pallas_src>
import functools

import jax
import jax.numpy as jnp
from jax.experimental import pallas as pl
from jax.experimental.pallas import tpu as pltpu


def _round_up(x, m):
    return (x + m - 1) // m * m


def _balance(total, tile_max, quantum):
    """Balanced tiling: n equal (quantum-rounded) tiles, minimal overshoot."""
    total_q = _round_up(total, quantum)
    n = pl.cdiv(total_q, tile_max)
    tile = _round_up(pl.cdiv(total_q, n), quantum)
    return tile, n, n * tile


def _vmem_capacity_bytes():
    """Per-core VMEM capacity (v5e/v6e: 128 MiB, v7x: 64 MiB per TC)."""
    try:
        info = pltpu.get_tpu_info()
        cap = getattr(info, "vmem_capacity_bytes", None)
        if cap:
            return int(cap)
    except Exception:
        pass
    return 64 * 1024 * 1024  # conservative fallback (v7x per-TC figure)


def _char_embedder_kernel(perm_ref, sfidx_ref, x_ref, wproj_ref, wsep_ref,
                          o_ref, acc_ref, *, wproj_resident, compute_dtype):
    # perm_ref / sfidx_ref : SMEM scalar prefetch (consumed only by index_maps)
    # x_ref    : VMEM (1, SEQ_TILE, K_TILE)      caller dtype (f32 or bf16)
    # wproj_ref: VMEM (N_K, K_TILE, D_PAD)       [resident, DMA'd once]
    #            or   (1, K_TILE, D_PAD)         [streamed fallback]
    # wsep_ref : VMEM (1, D_PAD, D_PAD)          language block picked by index_map
    # o_ref    : VMEM (1, SEQ_TILE, D_PAD)
    # acc_ref  : VMEM (SEQ_TILE, D_PAD) f32 scratch accumulator
    k = pl.program_id(2)

    @pl.when(k == 0)
    def _():
        acc_ref[...] = jnp.zeros_like(acc_ref)

    # In-kernel cast (no extra host pass over x); no-op if x is already bf16.
    x = x_ref[0].astype(compute_dtype)
    wp = wproj_ref[k] if wproj_resident else wproj_ref[0]
    acc_ref[...] += jnp.dot(x, wp, preferred_element_type=jnp.float32)

    @pl.when(k == pl.num_programs(2) - 1)
    def _():
        h = jnp.tanh(acc_ref[...]).astype(compute_dtype)          # (SEQ_TILE, D_PAD)
        y = jnp.tanh(jnp.dot(h, wsep_ref[0],
                             preferred_element_type=jnp.float32))
        o_ref[0] = y.astype(o_ref.dtype)


def char_embedder_forward(x_dense, file_idx, w_proj_t, w_sep_t, *,
                          seq_tile_max=512, k_tile_max=1024,
                          compute_dtype=jnp.bfloat16, out_dtype=jnp.float32):
    """x_dense : (batch, seq, char_vsize)  densified sparse ngram counts
       file_idx: (batch,) int32 language id per sentence
       w_proj_t: (char_vsize, d_word_vec)       char_emb_proj.weight.T
       w_sep_t : (lan_size, d_word_vec, d_word_vec)  sep_proj_list[l].weight.T
       returns : (batch, seq, d_word_vec) in out_dtype (f32 default = torch semantics;
                 bf16 halves writeback if the consumer accepts it)."""
    batch, seq, vsize = x_dense.shape
    d_word_vec = w_proj_t.shape[1]

    # ---- MXU / lane friendly padded sizes and balanced tiles ----------------
    # NOTE: d_pad=128 is ideal on v5e; on v6e/v7x a 256-wide N would fill the MXU,
    # but this kernel is HBM-bound so we keep the smaller (cheaper-to-write) pad.
    d_pad = _round_up(d_word_vec, 128)
    k_tile, n_k, v_pad = _balance(vsize, k_tile_max, 128)

    cbytes = jnp.dtype(compute_dtype).itemsize
    obytes = jnp.dtype(out_dtype).itemsize
    xbytes_est = max(jnp.dtype(x_dense.dtype).itemsize, cbytes)

    budget = int(0.7 * _vmem_capacity_bytes())

    def est(stile, resident):
        e = 2 * stile * k_tile * xbytes_est                  # x double buffer
        e += 2 * d_pad * d_pad * cbytes                      # w_sep double buffer
        e += 2 * stile * d_pad * obytes                      # out double buffer
        e += stile * d_pad * 4                               # f32 accumulator
        e += (2 * n_k if resident else 2) * k_tile * d_pad * cbytes
        return e

    stm = seq_tile_max
    while True:
        seq_tile, n_s, seq_pad = _balance(seq, stm, 8)
        if est(seq_tile, False) <= budget or stm <= 8:
            break
        stm = max(8, stm // 2)
    wproj_resident = est(seq_tile, True) <= budget

    # ---- host-side prep ------------------------------------------------------
    # Weights are small: cast/pad once, reshape w_proj to (n_k, k_tile, d_pad)
    # so the kernel can index K-tiles of a VMEM-resident (or streamed) copy.
    wp_p = jnp.pad(w_proj_t.astype(compute_dtype),
                   ((0, v_pad - vsize), (0, d_pad - d_word_vec)))
    wp_p = wp_p.reshape(n_k, k_tile, d_pad)
    ws_p = jnp.pad(w_sep_t.astype(compute_dtype),
                   ((0, 0), (0, d_pad - d_word_vec), (0, d_pad - d_word_vec)))

    need_x_pad = (seq_pad != seq) or (v_pad != vsize)
    if need_x_pad:
        # Single fused pad+cast pass.
        # TODO(synk): have the upstream sparse->dense step emit the aligned bf16
        # layout (or CSR ids/counts for a gather-accumulate kernel) so no host
        # pass over x is needed at all.
        x_in = jnp.pad(x_dense.astype(compute_dtype),
                       ((0, 0), (0, seq_pad - seq), (0, v_pad - vsize)))
    else:
        x_in = x_dense  # cast happens inside the kernel

    # Process sentences in file_idx-sorted order (indices only, no data copy)
    # so consecutive grid steps hit the same w_sep block and skip its DMA.
    perm = jnp.argsort(file_idx).astype(jnp.int32)
    sfidx = jnp.take(file_idx, perm).astype(jnp.int32)

    grid = (batch, seq_pad // seq_tile, n_k)

    if wproj_resident:
        wproj_spec = pl.BlockSpec((n_k, k_tile, d_pad),
                                  lambda b, s, k, perm, sf: (0, 0, 0))
    else:
        wproj_spec = pl.BlockSpec((1, k_tile, d_pad),
                                  lambda b, s, k, perm, sf: (k, 0, 0))

    grid_spec = pltpu.PrefetchScalarGridSpec(
        num_scalar_prefetch=2,
        grid=grid,
        in_specs=[
            pl.BlockSpec((1, seq_tile, k_tile),
                         lambda b, s, k, perm, sf: (perm[b], s, k)),
            wproj_spec,
            pl.BlockSpec((1, d_pad, d_pad),
                         lambda b, s, k, perm, sf: (sf[b], 0, 0)),
        ],
        out_specs=pl.BlockSpec((1, seq_tile, d_pad),
                               lambda b, s, k, perm, sf: (perm[b], s, 0)),
        scratch_shapes=[pltpu.VMEM((seq_tile, d_pad), jnp.float32)],
    )

    kernel = functools.partial(_char_embedder_kernel,
                               wproj_resident=wproj_resident,
                               compute_dtype=compute_dtype)

    vmem_limit = min(int(0.9 * _vmem_capacity_bytes()), 128 * 1024 * 1024)

    out = pl.pallas_call(
        kernel,
        out_shape=jax.ShapeDtypeStruct((batch, seq_pad, d_pad), out_dtype),
        grid_spec=grid_spec,
        compiler_params=pltpu.CompilerParams(
            dimension_semantics=("parallel", "parallel", "arbitrary"),
            vmem_limit_bytes=vmem_limit),
    )(perm, sfidx, x_in, wp_p, ws_p)

    # Slice back to the module's logical shape (could be deferred to the consumer).
    return out[:, :seq, :d_word_vec]


def char_embedder_ref(x_dense, file_idx, w_proj_t, w_sep_t,
                      compute_dtype=jnp.bfloat16):
    # Pure-JAX reference of the same torch forward branch, using the same
    # bf16-input / f32-accumulation numerics as the kernel.
    xb = x_dense.astype(compute_dtype)
    wp = w_proj_t.astype(compute_dtype)
    ws = w_sep_t.astype(compute_dtype)[file_idx]                   # (b, d, d)
    h = jnp.tanh(jnp.einsum("bsv,vd->bsd", xb, wp,
                            preferred_element_type=jnp.float32))
    return jnp.tanh(jnp.einsum("bsd,bde->bse", h.astype(compute_dtype), ws,
                               preferred_element_type=jnp.float32))


if __name__ == "__main__":
    key = jax.random.PRNGKey(0)

    def run_case(batch, seq, char_vsize, d_word_vec, lan_size, file_idx, case_key):
        k1, k2, k3, k4 = jax.random.split(case_key, 4)
        # x_train_char: sparse per-token char-ngram counts -> .to_dense() equivalent
        # (small non-negative integer counts, mostly zero).
        mask = (jax.random.uniform(k2, (batch, seq, char_vsize)) < 0.25)
        counts = jnp.floor(jax.random.uniform(k1, (batch, seq, char_vsize)) * 4.0 + 1.0)
        x_dense = (counts * mask).astype(jnp.float32)

        # PyTorch convention: Linear weight is (out, in).
        w_proj = jax.random.uniform(k3, (d_word_vec, char_vsize), jnp.float32,
                                    minval=-0.1, maxval=0.1)       # char_emb_proj.weight
        w_sep = jax.random.uniform(k4, (lan_size, d_word_vec, d_word_vec), jnp.float32,
                                   minval=-0.1, maxval=0.1)        # sep_proj_list[l].weight

        # Pre-transpose so the kernel computes x @ W (weights become (in, out)).
        w_proj_t = jnp.transpose(w_proj)                           # (char_vsize, d)
        w_sep_t = jnp.transpose(w_sep, (0, 2, 1))                  # (lan, d_in, d_out)

        out = jax.block_until_ready(
            char_embedder_forward(x_dense, file_idx, w_proj_t, w_sep_t))
        ref = char_embedder_ref(x_dense, file_idx, w_proj_t, w_sep_t)

        assert out.shape == (batch, seq, d_word_vec)
        assert jnp.allclose(out, ref, atol=1e-2, rtol=1e-2), "kernel mismatch vs reference"

    kA, kB = jax.random.split(key)
    # Aligned case: no host pad/cast pass over x, in-kernel bf16 cast,
    # VMEM-resident w_proj, unsorted languages exercising the perm path.
    run_case(4, 16, 256, 128, 3, jnp.array([2, 0, 1, 2], dtype=jnp.int32), kA)
    # Unaligned case: exercises the fused pad+cast fallback and weight padding.
    run_case(2, 7, 40, 32, 2, jnp.array([1, 0], dtype=jnp.int32), kB)

    print("KERNEL_OK")
</pallas_src>

<mosaic_0001>
module attributes {stable_mosaic.version = 11 : i64} {
  func.func @_char_embedder_kernel(%arg0: i32, %arg1: i32, %arg2: i32, %arg3: memref<4xi32, #tpu.memory_space<smem>>, %arg4: memref<4xi32, #tpu.memory_space<smem>>, %arg5: memref<1x16x256xf32, #tpu.memory_space<vmem>>, %arg6: memref<1x256x128xbf16, #tpu.memory_space<vmem>>, %arg7: memref<1x128x128xbf16, #tpu.memory_space<vmem>>, %arg8: memref<1x16x128xf32, #tpu.memory_space<vmem>>, %arg9: memref<16x128xf32, #tpu.memory_space<vmem>>) attributes {dimension_semantics = [#tpu.dimension_semantics<parallel>, #tpu.dimension_semantics<parallel>, #tpu.dimension_semantics<arbitrary>], iteration_bounds = array<i64: 4, 1, 1>, scalar_prefetch = 2 : i64, scratch_operands = 1 : i64, tpu.core_type = #tpu.core_type<tc>, window_params = [{transform_indices = @transform_0, window_bounds = array<i64: 1, 16, 256>}, {pipeline_mode = #tpu.pipeline_mode<synchronous>, transform_indices = @transform_1, window_bounds = array<i64: 1, 256, 128>}, {transform_indices = @transform_2, window_bounds = array<i64: 1, 128, 128>}, {transform_indices = @transform_3, window_bounds = array<i64: 1, 16, 128>}]} {
    %c0_i32 = arith.constant 0 : i32
    %0 = arith.cmpi eq, %arg2, %c0_i32 : i32
    %1 = arith.extui %0 : i1 to i32
    %c0_i32_0 = arith.constant 0 : i32
    %2 = arith.cmpi ne, %1, %c0_i32_0 : i32
    scf.if %2 {
      %cst_11 = arith.constant 0.000000e+00 : f32
      %16 = vector.broadcast %cst_11 : f32 to vector<16x128xf32>
      %c0_12 = arith.constant 0 : index
      %c0_13 = arith.constant 0 : index
      %17 = vector.load %arg9[%c0_12, %c0_13] : memref<16x128xf32, #tpu.memory_space<vmem>>, vector<16x128xf32>
      tpu.vector_store %arg9[%c0_12, %c0_13], %16 {strides = array<i32>} : memref<16x128xf32, #tpu.memory_space<vmem>>, vector<16x128xf32>,
    } else {
    }
    %c0 = arith.constant 0 : index
    %c0_1 = arith.constant 0 : index
    %c0_2 = arith.constant 0 : index
    %3 = vector.load %arg5[%c0, %c0_1, %c0_2] : memref<1x16x256xf32, #tpu.memory_space<vmem>>, vector<1x16x256xf32>
    %4 = vector.shape_cast %3 : vector<1x16x256xf32> to vector<16x256xf32>
    %5 = arith.truncf %4 : vector<16x256xf32> to vector<16x256xbf16>
    %6 = arith.index_cast %arg2 : i32 to index
    %c0_3 = arith.constant 0 : index
    %c0_4 = arith.constant 0 : index
    %7 = vector.load %arg6[%6, %c0_3, %c0_4] : memref<1x256x128xbf16, #tpu.memory_space<vmem>>, vector<1x256x128xbf16>
    %8 = vector.shape_cast %7 : vector<1x256x128xbf16> to vector<256x128xbf16>
    %c0_5 = arith.constant 0 : index
    %c0_6 = arith.constant 0 : index
    %9 = vector.load %arg9[%c0_5, %c0_6] : memref<16x128xf32, #tpu.memory_space<vmem>>, vector<16x128xf32>
    %cst = arith.constant dense<0.000000e+00> : vector<16x128xf32>
    %10 = tpu.matmul %5, %8, %cst {dimension_numbers = #tpu.dot_dimension_numbers<[1], [0], [0], [1], [0, 0, 1, 1], [], []>} : vector<16x256xbf16>, vector<256x128xbf16>, vector<16x128xf32> -> vector<16x128xf32>
    %11 = arith.addf %9, %10 : vector<16x128xf32>
    %c0_7 = arith.constant 0 : index
    %c0_8 = arith.constant 0 : index
    %12 = vector.load %arg9[%c0_7, %c0_8] : memref<16x128xf32, #tpu.memory_space<vmem>>, vector<16x128xf32>
    tpu.vector_store %arg9[%c0_7, %c0_8], %11 {strides = array<i32>} : memref<16x128xf32, #tpu.memory_space<vmem>>, vector<16x128xf32>,
    %c0_i32_9 = arith.constant 0 : i32
    %13 = arith.cmpi eq, %arg2, %c0_i32_9 : i32
    %14 = arith.extui %13 : i1 to i32
    %c0_i32_10 = arith.constant 0 : i32
    %15 = arith.cmpi ne, %14, %c0_i32_10 : i32
    scf.if %15 {
      %c0_11 = arith.constant 0 : index
      %c0_12 = arith.constant 0 : index
      %16 = vector.load %arg9[%c0_11, %c0_12] : memref<16x128xf32, #tpu.memory_space<vmem>>, vector<16x128xf32>
      %17 = math.tanh %16 : vector<16x128xf32>
      %18 = arith.truncf %17 : vector<16x128xf32> to vector<16x128xbf16>
      %c0_13 = arith.constant 0 : index
      %c0_14 = arith.constant 0 : index
      %c0_15 = arith.constant 0 : index
      %19 = vector.load %arg7[%c0_13, %c0_14, %c0_15] : memref<1x128x128xbf16, #tpu.memory_space<vmem>>, vector<1x128x128xbf16>
      %20 = vector.shape_cast %19 : vector<1x128x128xbf16> to vector<128x128xbf16>
      %cst_16 = arith.constant dense<0.000000e+00> : vector<16x128xf32>
      %21 = tpu.matmul %18, %20, %cst_16 {dimension_numbers = #tpu.dot_dimension_numbers<[1], [0], [0], [1], [0, 0, 1, 1], [], []>} : vector<16x128xbf16>, vector<128x128xbf16>, vector<16x128xf32> -> vector<16x128xf32>
      %22 = math.tanh %21 : vector<16x128xf32>
      %c0_17 = arith.constant 0 : index
      %c0_18 = arith.constant 0 : index
      %c0_19 = arith.constant 0 : index
      %23 = vector.load %arg8[%c0_17, %c0_18, %c0_19] : memref<1x16x128xf32, #tpu.memory_space<vmem>>, vector<1x16x128xf32>
      %24 = vector.shape_cast %23 : vector<1x16x128xf32> to vector<16x128xf32>
      %25 = vector.shape_cast %22 : vector<16x128xf32> to vector<1x16x128xf32>
      tpu.vector_store %arg8[%c0_17, %c0_18, %c0_19], %25 {strides = array<i32>} : memref<1x16x128xf32, #tpu.memory_space<vmem>>, vector<1x16x128xf32>,
    } else {
    }
    return
  }
  func.func @transform_0(%arg0: i32, %arg1: i32, %arg2: i32, %arg3: memref<4xi32, #tpu.memory_space<smem>>, %arg4: memref<4xi32, #tpu.memory_space<smem>>) -> (i32, i32, i32) {
    %0 = arith.index_cast %arg0 : i32 to index
    %1 = memref.load %arg3[%0] : memref<4xi32, #tpu.memory_space<smem>>
    %c0_i32 = arith.constant 0 : i32
    return %1, %arg1, %arg2 : i32, i32, i32
  }
  func.func @transform_1(%arg0: i32, %arg1: i32, %arg2: i32, %arg3: memref<4xi32, #tpu.memory_space<smem>>, %arg4: memref<4xi32, #tpu.memory_space<smem>>) -> (i32, i32, i32) {
    %c0_i32 = arith.constant 0 : i32
    %c0_i32_0 = arith.constant 0 : i32
    %c0_i32_1 = arith.constant 0 : i32
    %c0_i32_2 = arith.constant 0 : i32
    return %c0_i32, %c0_i32_0, %c0_i32_1 : i32, i32, i32
  }
  func.func @transform_2(%arg0: i32, %arg1: i32, %arg2: i32, %arg3: memref<4xi32, #tpu.memory_space<smem>>, %arg4: memref<4xi32, #tpu.memory_space<smem>>) -> (i32, i32, i32) {
    %0 = arith.index_cast %arg0 : i32 to index
    %1 = memref.load %arg4[%0] : memref<4xi32, #tpu.memory_space<smem>>
    %c0_i32 = arith.constant 0 : i32
    %c0_i32_0 = arith.constant 0 : i32
    %c0_i32_1 = arith.constant 0 : i32
    return %1, %c0_i32, %c0_i32_0 : i32, i32, i32
  }
  func.func @transform_3(%arg0: i32, %arg1: i32, %arg2: i32, %arg3: memref<4xi32, #tpu.memory_space<smem>>, %arg4: memref<4xi32, #tpu.memory_space<smem>>) -> (i32, i32, i32) {
    %0 = arith.index_cast %arg0 : i32 to index
    %1 = memref.load %arg3[%0] : memref<4xi32, #tpu.memory_space<smem>>
    %c0_i32 = arith.constant 0 : i32
    %c0_i32_0 = arith.constant 0 : i32
    return %1, %arg1, %c0_i32 : i32, i32, i32
  }
}

</mosaic_0001>

<bundles_post_ra>
// kernel: tpu_custom_call.1
= control target key start
LH: loop header
LB: loop body
LE: loop exit
PB: predicated region body
PF: predicated region fallthrough
CT: control target
= control target key end

     0   :  { %s1718_s0 = inlined_call_operand.hbm [shape: s32[4], index: 0, kind: input, shape index: {}]   ;;  %s1719_s2 = inlined_call_operand.hbm [shape: f32[4,16,256], index: 2, kind: input, shape index: {}]   ;;  %s1720_s3 = inlined_call_operand.hbm [shape: bf16[1,256,128], index: 3, kind: input, shape index: {}]   ;;  %s1721_s4 = inlined_call_operand.hbm [shape: bf16[3,128,128], index: 4, kind: input, shape index: {}]   ;;  %s1722_s5 = inlined_call_operand.hbm [shape: f32[4,16,128], index: 5, kind: output, shape index: {}]   ;;  %s1723_s1 = inlined_call_operand.vmem [shape: s32[4], index: 1, kind: input, shape index: {}]  }
   0x1   :  { %1737 = sst [smem:[#allocation28_spill]] %s1719_s2  ;;  %s1021_s20 = scalar_lea.hbm %s1718_s0, 16 }
   0x2   :  { %1738 = sst [smem:[#allocation29_spill]] %s1721_s4  ;;  %p1022_p0 = scmp.ne.s32.totalorder %s1718_s0, %s1021_s20 }
   0x3   :  { %1739 = sst [smem:[#allocation30_spill]] %s1722_s5  ;;  %p1025_p1 = scmp.lt.u32.totalorder %s1021_s20, %s1718_s0 }
   0x5   :  { %p1027_p2 = pnand %p1025_p1, %p1022_p0 }
   0x7   :  { %1030 = shalt.err (!%p1027_p2)  }
   0x8   :  { %s1273_s25 = smov [#allocation4]   ;;  %s12_s30 = sshll.u32 %s1723_s1, 4  ;;  %s13_s30 = int_to_ptr.vmem [resolvable:$true] %s12_s30 }
   0x9   :  { %11 = dma.hbm_to_smem %s1718_s0, 16, %s1273_s25, [#allocation3] }
   0xa   :  { %s1031_s6 = scalar_lea.vmem %s13_s30, 16  ;;  %p1036_p4 = scmp.lt.s32.totalorder %s13_s30, %s13_s30 }
   0xb   :  { %p1032_p3 = scmp.ne.s32.totalorder %s13_s30, %s1031_s6  ;;  %p1037_p5 = scmp.lt.s32.totalorder %s1031_s6, %s1031_s6 }
   0xd   :  { %p1038_p6 = por %p1037_p5, %p1036_p4 }
   0xf   :  { %p1039_p7 = pnand %p1038_p6, %p1032_p3 }
  0x11   :  { %1042 = shalt.err (!%p1039_p7)  }
  0x12   :  { %s1274_s7 = smov [#allocation5]  }
  0x13   :  { %15 = dma.vmem_to_smem %s13_s30, 16, %s1274_s7, [#allocation3] }
  0x14   :  { %1207 = dma.done.wait [#allocation3], 32 }
  0x15   :  { %1208 = vsyncadd [#allocation3], 4294967264 }
  0x16   :  { %17 = sfence }
  0x17   :  { %18 = vsyncpa [#allocation7], 0 }
  0x18   :  { %20 = vsyncpa [#allocation7 + $0x1], 0 }
  0x19   :  { %21 = vsyncpa [#allocation10], 0 }
  0x1a   :  { %22 = vsyncpa [#allocation8], 0 }
  0x1b   :  { %24 = vsyncpa [#allocation8 + $0x1], 0  ;;  %s1332_s0 = smov 0   ;;  %s1334_s1 = smov 0  }
  0x1c   :  { %s1336_s8 = smov 0   ;;  %s1338_s9 = smov 0  }
  0x1d   :  { %s1340_s10 = smov 0   ;;  %s1342_s11 = smov 0  }
  0x1e   :  { %s1344_s12 = smov 0   ;;  %s1346_s13 = smov 0  }
  0x1f   :  { %s1348_s14 = smov 0   ;;  %s1350_s15 = smov 0  }
  0x20   :  { %s1352_s16 = smov 0   ;;  %s1354_s17 = smov 0  }
  0x21 LB: > { %1740 = sst [smem:[#allocation23_spill]] %s1247_s11  ;;  %s49_s18 = sadd.s32 1, %s1267_s16  ;;  %s1271_s17 = sphi %s1354_s17, %s30_s17   ;;  %s1267_s16 = sphi %s1352_s16, %s1785_s16   ;;  %s1263_s15 = sphi %s1350_s15, %s1784_s15   ;;  %s1259_s14 = sphi %s1348_s14, %s1774_s14   ;;  %s1255_s13 = sphi %s1346_s13, %s1783_s13   ;;  %s1251_s12 = sphi %s1344_s12, %s1782_s12   ;;  %s1247_s11 = sphi %s1342_s11, %s1781_s11   ;;  %s1243_s10 = sphi %s1340_s10, %s1780_s10   ;;  %s1239_s9 = sphi %s1338_s9, %s1779_s9   ;;  %s1235_s8 = sphi %s1336_s8, %s1778_s8   ;;  %s1231_s1 = sphi %s1334_s1, %s1777_s1   ;;  %s1227_s0 = sphi %s1332_s0, %s1776_s0  }
  0x22   : > { %1741 = sst [smem:[#allocation24_spill]] %s1259_s14  ;;  %p51_p8 = scmp.ge.s32.totalorder %s49_s18, 4 }
  0x23   : > { %1742 = sst [smem:[#allocation25_spill]] %s1263_s15  ;;  %s62_s20 = sadd.s32 1, %s1259_s14 }
  0x24   : > { %s53_s19 = sld [smem:[#allocation4 + %s1267_s16]]  ;;  %p69_p9 = scmp.ne.s32.totalorder %s1259_s14, %s1255_s13 }
  0x25   : > { %p1729_p10 = scmp.eq.s32.totalorder %s1271_s17, 0  ;;  %s1787_s18 = smov (%p51_p8, %s49_s18), 0 }
  0x26   : > { %1743 = sst [smem:[#allocation26_spill]] %s1787_s18  ;;  %p1727_p12 = scmp.lt.s32.totalorder %s1271_s17, 4 }
  0x27   : > { %p1402_p11 = por %p1729_p10, %p69_p9  ;;  %s1407_s22 = sld [smem:[#allocation4 + %s1267_s16]] }
  0x28   : > { %s54_s23 = sld [smem:[#allocation4 + %s1787_s18]]  ;;  %s191_s24 = sand.u32 1, %s1271_s17  }
  0x29   : > { %s193_s25 = sand.u32 1, %s1259_s14   ;;  %p1417_p13 = pnand %p1727_p12, %p1402_p11 }
  0x2a   : > { %s749_s26 = sshll.u32 %s193_s25, 5  ;;  %s1747_s2 = sld [smem:[#allocation28_spill]] }
  0x2b   : > { %s845_s28 = scalar_select %p1402_p11, [#allocation4], [#allocation13] }
  0x2c   : > { %s195_s30 = scalar_lea.vmem [#allocation6], %s749_s26  ;;  %p1045_p2 = pneg %p1417_p13 }
  0x2d   : > { %s208_s6 = sshll.u32 %s195_s30, 4  ;;  %s1789_s28 = smov (!%p1727_p12, %s845_s28), [#allocation16]  ;;  %s1423_s6 = int_to_ptr.vmem [resolvable:$true] %s208_s6 }
  0x2e   : > { %s55_s29 = ssub.s32 %s53_s19, %s54_s23  ;;  %s1440_s23 = scalar_lea.sflag [#allocation7], %s191_s24 }
  0x2f   : > { %p60_p0 = scmp.eq.s32.totalorder %s55_s29, 0 }
  0x30   : > { %s846_s7 = scalar_select %p1402_p11, %s1267_s16, 0 }
  0x31   : > { %s1429_s5 = scalar_select %p60_p0, %s1259_s14, %s62_s20  }
  0x32   : > { %s1791_s7 = smov (!%p1727_p12, %s846_s7), 0  ;;  %s1048_s4 = scalar_lea.hbm %s1747_s2, 2048 }
  0x33   : > { %1746 = sst [smem:[#allocation27_spill]] %s1429_s5 }
  0x34   : > { %s196_s25 = sld [smem:[%s1789_s28 + %s1791_s7]] }
  0x3a   : > { %s789_s15 = sshll.u32 %s196_s25, 9 }
  0x3b   : > { %s1438_s19 = scalar_lea.hbm %s1747_s2, %s789_s15 }
  0x3c   : > { %s1043_s21 = scalar_lea.hbm %s1438_s19, 512  ;;  %p1049_p5 = scmp.lt.u32.totalorder %s1438_s19, %s1747_s2 }
  0x3d   : > { %p1044_p1 = scmp.ne.s32.totalorder %s1438_s19, %s1043_s21  ;;  %p1050_p6 = scmp.lt.u32.totalorder %s1048_s4, %s1043_s21 }
  0x3e   : > { %p1052_p8 = scmp.lt.u32.totalorder %s1043_s21, %s1438_s19 }
  0x3f   : > { %p1046_p3 = pnand %p1045_p2, %p1044_p1  ;;  %p1051_p7 = por %p1050_p6, %p1049_p5 }
  0x41   : > { %p1047_p4 = pneg %p1046_p3  ;;  %p1053_p9 = por %p1052_p8, %p1051_p7 }
  0x43   : > { %p1054_p11 = pnand %p1053_p9, %p1047_p4 }
  0x45   : > { %1057 = shalt.err (!%p1054_p11)
}
  0x46   : > { %s1058_s24 = scalar_lea.vmem %s1423_s6, 512  ;;  %s1275_s28 = smov [#allocation6]  }
  0x47   : > { %p1059_p0 = scmp.ne.s32.totalorder %s1423_s6, %s1058_s24  ;;  %s1063_s29 = sshll.u32 %s1275_s28, 4  ;;  %s1064_s29 = int_to_ptr.vmem [resolvable:$false] %s1063_s29 }
  0x48   : > { %s1065_s30 = scalar_lea.vmem %s1064_s29, 1024  ;;  %p1066_p12 = scmp.lt.s32.totalorder %s1423_s6, %s1064_s29 }
  0x49   : > { %p1061_p1 = pnand %p1059_p0, %p1045_p2  ;;  %p1067_p5 = scmp.lt.s32.totalorder %s1065_s30, %s1058_s24 }
  0x4b   : > { %p1062_p3 = pneg %p1061_p1  ;;  %p1068_p6 = por %p1067_p5, %p1066_p12 }
  0x4d   : > { %p1069_p7 = pnand %p1068_p6, %p1062_p3 }
  0x4f   : > { %1072 = shalt.err (!%p1069_p7)
}
  0x50   : > { %s1276_s7 = smov 256   ;;  %s1277_s25 = smov 16  }
  0x51   : > { %868 = dma.hbm_to_vmem [thread:$0]  (!%p1417_p13), %s1438_s19, 512, %s1423_s6, %s1440_s23, %s1276_s7, %s1276_s7, %s1277_s25  }
  0x52   : > { %s1469_s21 = sadd.s32 4294967295, %s1271_s17   ;;  %s745_s20 = sadd.s32 4294967294, %s1271_s17  }
  0x53   : > { %p75_p12 = scmp.ne.s32.totalorder %s1255_s13, %s1251_s12  ;;  %p1728_p2 = scmp.eq.s32.totalorder %s1469_s21, 0 }
  0x54   : > { %p124_p4 = scmp.ne.s32.totalorder %s1243_s10, %s1239_s9  ;;  %s135_s26 = sld [smem:[#allocation4 + %s1787_s18]] }
  0x55   : > { %s141_s4 = sadd.s32 1, %s1235_s8  ;;  %p1481_p8 = por %p1728_p2, %p75_p12 }
  0x56   : > { %p1487_p13 = por %p124_p4, %p1728_p2  ;;  %p151_p9 = scmp.ne.s32.totalorder %s1235_s8, %s1231_s1 }
  0x57   : > { %s1748_s27 = scalar_select %p1481_p8, 1, 0 }
  0x58   : > { %s1749_s6 = scalar_select %p1487_p13, 1, 0 }
  0x59   : > { %p152_p11 = scmp.eq.s32.totalorder %s1469_s21, 3  ;;  %p157_p0 = scmp.ne.s32.totalorder %s1231_s1, %s1227_s0 }
  0x5a   : > { %p158_p1 = scmp.eq.s32.totalorder %s745_s20, 3  ;;  %p746_p5 = scmp.ge.s32.totalorder %s1271_s17, 1 }
  0x5b   : > { %p1496_p3 = por %p152_p11, %p151_p9  ;;  %p165_p7 = scmp.lt.s32.totalorder %s1271_s17, 5 }
  0x5c   : > { %p1501_p6 = por %p158_p1, %p157_p0  ;;  %s136_s19 = ssub.s32 %s1407_s22, %s135_s26 }
  0x5d   : > { %s1750_s9 = scalar_select %p1496_p3, 1, 0 }
  0x5e   : > { %s1751_s12 = scalar_select %p1501_p6, 1, 0 }
  0x5f   : > { %p139_p12 = scmp.eq.s32.totalorder %s136_s19, 0  ;;  %p1507_p4 = pnand %p746_p5, %p165_p7 }
  0x60   : > { %s1278_s24 = smov [#allocation9]   ;;  %s106_s22 = sld [smem:[#allocation5 + %s1267_s16]] }
  0x61   : > { %s1752_s11 = scalar_select %p1507_p4, 1, 0 }
  0x62   : > { %s1512_s15 = scalar_select %p139_p12, %s1235_s8, %s141_s4  }
  0x63   : > { %p859_p9 = pneg %p1507_p4  ;;  %s177_s28 = sshll.u32 %s1278_s24, 4  ;;  %s178_s28 = int_to_ptr.vmem [resolvable:$true] %s177_s28 }
  0x64   : > { %s107_s30 = sld [smem:[#allocation5 + %s1787_s18]]  ;;  %s1073_s20 = scalar_lea.hbm %s1720_s3, 2048 }
  0x65   : > { %p1518_p11 = pnand %p859_p9, %p1728_p2  ;;  %p1074_p0 = scmp.ne.s32.totalorder %s1720_s3, %s1073_s20 }
  0x66   : > { %p1080_p12 = scmp.lt.u32.totalorder %s1073_s20, %s1720_s3 }
  0x67   : > { %p1075_p1 = pneg %p1518_p11 }
  0x69   : > { %p1076_p5 = pnand %p1075_p1, %p1074_p0 }
  0x6b   : > { %p1077_p7 = pneg %p1076_p5 }
  0x6d   : > { %p1082_p9 = pnand %p1080_p12, %p1077_p7 }
  0x6f   : > { %1085 = shalt.err (!%p1082_p9)
}
  0x70   : > { %s1086_s2 = scalar_lea.vmem %s178_s28, 2048  ;;  %p1094_p3 = scmp.lt.s32.totalorder %s178_s28, %s178_s28 }
  0x71   : > { %p1087_p2 = scmp.ne.s32.totalorder %s178_s28, %s1086_s2  ;;  %p1095_p13 = scmp.lt.s32.totalorder %s1086_s2, %s1086_s2 }
  0x73   : > { %p1089_p10 = pnand %p1087_p2, %p1075_p1  ;;  %p1096_p8 = por %p1095_p13, %p1094_p3 }
  0x75   : > { %p1090_p6 = pneg %p1089_p10 }
  0x77   : > { %p1097_p4 = pnand %p1096_p8, %p1090_p6 }
  0x79   : > { %1100 = shalt.err (!%p1097_p4)
}
  0x7a   : > { %s1736_s7 = smov 64   ;;  %s1754_s25 = sld [smem:[#allocation23_spill]] }
  0x7b   : > { %s1280_s20 = smov 4   ;;  %p1755_p2 = scmp.eq.s32.totalorder %s1271_s17, 0 }
  0x7c   : > { %862 = dma.hbm_to_vmem [thread:$0]  (!%p1518_p11), %s1720_s3, 2048, %s178_s28, [#allocation10], %s1736_s7, %s1736_s7, %s1280_s20  }
  0x7d   : > { %s108_s19 = ssub.s32 %s106_s22, %s107_s30  ;;  %p1756_p3 = scmp.lt.s32.totalorder %s1271_s17, 4 }
  0x7e   : > { %p109_p13 = scmp.eq.s32.totalorder %s108_s19, 0  ;;  %s1760_s19 = sld [smem:[#allocation29_spill]] }
  0x7f   : > { %p1757_p6 = pmov %p1756_p3  ;;  %p1758_p4 = pmov %p1756_p3 }
  0x80   : > { %p118_p10 = scmp.ne.s32.totalorder %s1754_s25, %s1243_s10  ;;  %s220_s4 = sand.u32 1, %s1754_s25  }
  0x81   : > { %s111_s24 = sadd.s32 1, %s1754_s25  ;;  %s752_s18 = sshll.u32 %s220_s4, 6 }
  0x82   : > { %p120_p8 = por %p118_p10, %p1755_p2  ;;  %s1793_s25 = smov (!%p109_p13, %s1754_s25), %s111_s24 }
  0x83   : > { %s222_s22 = scalar_lea.vmem [#allocation11], %s752_s18 }
  0x84   : > { %s848_s5 = scalar_select %p120_p8, [#allocation5], [#allocation14] }
  0x85   : > { %s849_s14 = scalar_select %p120_p8, %s1267_s16, 0 }
  0x86   : > { %s1795_s5 = smov (!%p1756_p3, %s848_s5), [#allocation17]  ;;  %p1559_p0 = pnand %p1758_p4, %p120_p8 }
  0x87   : > { %s1797_s14 = smov (!%p1757_p6, %s849_s14), 0  ;;  %s230_s30 = sshll.u32 %s222_s22, 4  ;;  %s1563_s30 = int_to_ptr.vmem [resolvable:$true] %s230_s30 }
  0x88   : > { %s223_s28 = sld [smem:[%s1795_s5 + %s1797_s14]]  ;;  %p1103_p1 = pneg %p1559_p0 }
  0x89   : > { %s1106_s18 = scalar_lea.hbm %s1760_s19, 3072 }
  0x8e   : > { %s790_s2 = sshll.u32 %s223_s28, 10 }
  0x8f   : > { %s1568_s24 = scalar_lea.hbm %s1760_s19, %s790_s2 }
  0x90   : > { %s1101_s7 = scalar_lea.hbm %s1568_s24, 1024  ;;  %p1107_p12 = scmp.lt.u32.totalorder %s1568_s24, %s1760_s19 }
  0x91   : > { %p1102_p11 = scmp.ne.s32.totalorder %s1568_s24, %s1101_s7  ;;  %p1108_p9 = scmp.lt.u32.totalorder %s1106_s18, %s1101_s7 }
  0x92   : > { %p1110_p2 = scmp.lt.u32.totalorder %s1101_s7, %s1568_s24 }
  0x93   : > { %p1104_p5 = pnand %p1103_p1, %p1102_p11  ;;  %p1109_p10 = por %p1108_p9, %p1107_p12 }
  0x95   : > { %p1105_p7 = pneg %p1104_p5  ;;  %p1111_p8 = por %p1110_p2, %p1109_p10 }
  0x97   : > { %p1112_p13 = pnand %p1111_p8, %p1105_p7 }
  0x99   : > { %1115 = shalt.err (!%p1112_p13)
}
  0x9a   : > { %s1116_s2 = scalar_lea.vmem %s1563_s30, 1024  ;;  %s1281_s26 = smov [#allocation11]  }
  0x9b   : > { %p1117_p3 = scmp.ne.s32.totalorder %s1563_s30, %s1116_s2  ;;  %s1121_s4 = sshll.u32 %s1281_s26, 4  ;;  %s1122_s4 = int_to_ptr.vmem [resolvable:$false] %s1121_s4 }
  0x9c   : > { %s1123_s5 = scalar_lea.vmem %s1122_s4, 2048  ;;  %p1124_p11 = scmp.lt.s32.totalorder %s1563_s30, %s1122_s4 }
  0x9d   : > { %p1119_p6 = pnand %p1117_p3, %p1103_p1  ;;  %p1125_p5 = scmp.lt.s32.totalorder %s1123_s5, %s1116_s2 }
  0x9f   : > { %p1120_p4 = pneg %p1119_p6  ;;  %p1126_p12 = por %p1125_p5, %p1124_p11 }
  0xa1   : > { %p1127_p9 = pnand %p1126_p12, %p1120_p4 }
  0xa3   : > { %1130 = shalt.err (!%p1127_p9)
}
  0xa4   : > { %s1761_s7 = smov 64   ;;  %p1762_p1 = scmp.ne.s32.totalorder %s1752_s11, 0 }
  0xa5   : > { %873 = dma.hbm_to_vmem [thread:$0]  (!%p1559_p0), %s1568_s24, 1024, %s1563_s30, %s1440_s23, %s1761_s7, %s1761_s7, %s1280_s20  }
  0xa6   : > { %242 = sbr.rel (%p1762_p1) target bundleno = 684 (0x2ac), region = 32  ;;  %s244_s14 = sand.u32 (!%p1762_p1), 1, %s1469_s21  }
  0xa7   : > { %s246_s18 = sand.u32 (!%p1762_p1), 1, %s1255_s13   ;;  %s245_s22 = scalar_lea.sflag (!%p1762_p1), [#allocation7], %s244_s14 }
  0xa8   : > { %s756_s28 = sshll.u32 (!%p1762_p1), %s246_s18, 5  ;;  %p1763_p7 = scmp.ne.s32.totalorder (!%p1762_p1), %s1748_s27, 0 }
  0xa9   : > { %s1603_s2 = scalar_lea.vmem (!%p1762_p1), [#allocation6], %s756_s28 }
  0xad   : > { %1210 = dma.done.wait (%p1763_p7), %s245_s22, 512  }
  0xae   : > { %1212 = vsyncadd (%p1763_p7), %s245_s22, 4294966784  ;;  %p1764_p10 = scmp.eq.s32.totalorder %s1469_s21, 0 }
  0xb0   : > { %1214 = dma.done.wait (%p1764_p10), [#allocation10], 2048   ;;  %p1765_p0 = pmov %p1764_p10 }
  0xb1   : > { %s259_s23 = sand.u32 1, %s1243_s10   ;;  %p1766_p2 = scmp.ne.s32.totalorder %s1749_s6, 0 }
  0xb2   : > { %1216 = vsyncadd (%p1765_p0), [#allocation10], 4294965248  ;;  %s758_s11 = sshll.u32 %s259_s23, 6 }
  0xb3   : > { %s1614_s20 = scalar_lea.vmem [#allocation11], %s758_s11 }
  0xb4   : > { %1218 = dma.done.wait (%p1766_p2), %s245_s22, 1024  }
  0xb5   : > { %1220 = vsyncadd (%p1766_p2), %s245_s22, 4294966272  ;;  %v1282_v0 = vmov 0.0   ;;  %v989_v1 = vld [vmem:[#allocation9 + $0x40] sm:$0xff]   ;;  %v991_v3 = vld [vmem:[#allocation9 + $0x48] sm:$0xff]   ;;  %vm1283_vm0 = vmmov 0   ;;  %s1767_s21 = sld [smem:[#allocation25_spill]] }
  0xb6   : > { %823 = vmatprep.subr.bf16.mxu1 %v1282_v0  ;;  %v990_v2 = vld [vmem:[#allocation9] sm:$0xff]   ;;  %792 = vmatprep.subr.bf16.mxu0 %v989_v1  ;;  %v992_v4 = vld [vmem:[#allocation9 + $0x8] sm:$0xff]   ;;  %v993_v5 = vld [vmem:[#allocation9 + $0x50] sm:$0xff]   ;;  %p1768_p8 = scmp.ne.s32.totalorder %s1750_s9, 0  ;;  %s286_s6 = sand.u32 1, %s1231_s1  }
  0xb7   : > { %793 = vmatpush3.bf16.msra.mxu0 %v990_v2  ;;  %v994_v6 = vld [vmem:[#allocation9 + $0x10] sm:$0xff]   ;;  %v995_v7 = vld [vmem:[#allocation9 + $0x58] sm:$0xff]   ;;  %v997_v9 = vld [vmem:[#allocation9 + $0x60] sm:$0xff]   ;;  %839 = vmatprep.mubr.msk.bf16.mxu1 %vm1283_vm0, %v1282_v0  ;;  %s759_s30 = sshll.u32 %s286_s6, 4  ;;  %s1769_s14 = sld [smem:[#allocation30_spill]] }
  0xb8   : > { %794 = vmatprep.subr.bf16.mxu0 %v991_v3  ;;  %v996_v8 = vld [vmem:[#allocation9 + $0x18] sm:$0xff]   ;;  %v998_v10 = vld [vmem:[#allocation9 + $0x20] sm:$0xff]   ;;  %v999_v11 = vld [vmem:[#allocation9 + $0x68] sm:$0xff]   ;;  %s855_s27 = scalar_select %p1768_p8, [#allocation4], [#allocation15] }
  0xb9   : > { %v303_v12 = vld [vmem:[%s1603_s2 + $0x8] sm:$0xff]  ;;  %v305_v13 = vld [vmem:[%s1603_s2 + $0x18] sm:$0xff]  ;;  %v1005_v16 = vld [vmem:[%s1614_s20] sm:$0xff]   ;;  %s288_s24 = scalar_lea.vmem [#allocation12], %s759_s30  ;;  %s1654_s22 = scalar_lea.sflag [#allocation8], %s286_s6 }
  0xba   : > { %v1000_v14 = vld [vmem:[#allocation9 + $0x28] sm:$0xff]   ;;  %v307_v15 = vpack.c.bf16 %v305_v13, %v303_v12  ;;  %v1001_v17 = vld [vmem:[#allocation9 + $0x70] sm:$0xff]   ;;  %824 = vmatpush3.bf16.msra.mxu1 %v1005_v16  ;;  %v1003_v20 = vld [vmem:[#allocation9 + $0x78] sm:$0xff]   ;;  %s620_s26 = sshll.u32 %s288_s24, 4  ;;  %s1284_s23 = smov [#allocation12]   ;;  %s1647_s26 = int_to_ptr.vmem [resolvable:$true] %s620_s26 }
  0xbb   : > { %795 = vmatpush3.bf16.msra.mxu0 %v992_v4  ;;  %v1006_v18 = vld [vmem:[%s1614_s20 + $0x8] sm:$0xff]   ;;  %825 = vmatprep.subr.bf16.mxu1 %v1282_v0  ;;  %v1002_v19 = vld [vmem:[#allocation9 + $0x30] sm:$0xff]   ;;  %v1004_v22 = vld [vmem:[#allocation9 + $0x38] sm:$0xff]   ;;  %s1799_s21 = smov (!%p1768_p8, %s1767_s21), 0  ;;  %s1135_s11 = sshll.u32 %s1284_s23, 4  ;;  %s1136_s11 = int_to_ptr.vmem [resolvable:$false] %s1135_s11 }
  0xbc   : > { %796 = vmatprep.subr.bf16.mxu0 %v993_v5  ;;  %473 = vmatprep.mubr.bf16.mxu0 %v307_v15  ;;  %v1007_v21 = vld [vmem:[%s1614_s20 + $0x10] sm:$0xff]   ;;  %v302_v23 = vld [vmem:[%s1603_s2] sm:$0xff]  ;;  %v1008_v26 = vld [vmem:[%s1614_s20 + $0x18] sm:$0xff]   ;;  %s611_s29 = sld [smem:[%s855_s27 + %s1799_s21]]  ;;  %p1138_p4 = scmp.lt.s32.totalorder %s1647_s26, %s1136_s11 }
  0xbd   : > { %v304_v24 = vld [vmem:[%s1603_s2 + $0x10] sm:$0xff]  ;;  %v1009_v27 = vld [vmem:[%s1614_s20 + $0x20] sm:$0xff]   ;;  %v1010_v28 = vld [vmem:[%s1614_s20 + $0x28] sm:$0xff]   ;;  %s1770_s18 = smov %s1769_s14  ;;  %s1131_s2 = scalar_lea.vmem %s1647_s26, 256 }
  0xbe   : > { %826 = vmatpush3.bf16.msra.mxu1 %v1006_v18  ;;  %v306_v25 = vpack.c.bf16 %v304_v24, %v302_v23  ;;  %v1011_v29 = vld [vmem:[%s1614_s20 + $0x30] sm:$0xff]   ;;  %v1012_v30 = vld [vmem:[%s1614_s20 + $0x38] sm:$0xff]   ;;  %p1132_p13 = scmp.ne.s32.totalorder %s1647_s26, %s1131_s2  ;;  %s1137_s20 = scalar_lea.vmem %s1136_s11, 512 }
  0xbf   : > { %797 = vmatpush3.bf16.msra.mxu0 %v994_v6  ;;  %827 = vmatprep.subr.bf16.mxu1 %v1282_v0  ;;  %p1139_p11 = scmp.lt.s32.totalorder %s1137_s20, %s1131_s2 }
  0xc0   : > { %798 = vmatprep.subr.bf16.mxu0 %v995_v7  ;;  %p1133_p3 = pnand %p1132_p13, %p1768_p8 }
  0xc1   : > { %p1140_p5 = por %p1139_p11, %p1138_p4 }
  0xc2   : > { %828 = vmatpush3.bf16.msra.mxu1 %v1007_v21  ;;  %s791_s4 = sshll.u32 %s611_s29, 8  ;;  %p1134_p6 = pneg %p1133_p3 }
  0xc3   : > { %799 = vmatpush3.bf16.msra.mxu0 %v996_v8  ;;  %829 = vmatprep.subr.bf16.mxu1 %v1282_v0  ;;  %s1652_s28 = scalar_lea.hbm %s1769_s14, %s791_s4 }
  0xc4   : > { %800 = vmatprep.subr.bf16.mxu0 %v997_v9  ;;  %p1141_p12 = pnand %p1140_p5, %p1134_p6 }
  0xc6   : > { %830 = vmatpush3.bf16.msra.mxu1 %v1008_v26 }
  0xc7   : > { %801 = vmatpush3.bf16.msra.mxu0 %v998_v10  ;;  %831 = vmatprep.subr.bf16.mxu1 %v1282_v0 }
  0xc8   : > { %802 = vmatprep.subr.bf16.mxu0 %v999_v11 }
  0xca   : > { %832 = vmatpush3.bf16.msra.mxu1 %v1009_v27 }
  0xcb   : > { %803 = vmatpush3.bf16.msra.mxu0 %v1000_v14  ;;  %833 = vmatprep.subr.bf16.mxu1 %v1282_v0 }
  0xcc   : > { %804 = vmatprep.subr.bf16.mxu0 %v1001_v17 }
  0xce   : > { %834 = vmatpush3.bf16.msra.mxu1 %v1010_v28 }
  0xcf   : > { %805 = vmatpush3.bf16.msra.mxu0 %v1002_v19  ;;  %835 = vmatprep.subr.bf16.mxu1 %v1282_v0 }
  0xd0   : > { %806 = vmatprep.subr.bf16.mxu0 %v1003_v20 }
  0xd2   : > { %836 = vmatpush3.bf16.msra.mxu1 %v1011_v29 }
  0xd3   : > { %807 = vmatpush3.bf16.msra.mxu0 %v1004_v22  ;;  %837 = vmatprep.subr.bf16.mxu1 %v1282_v0 }
  0xd6   : > { %474 = vmatmul.mubr.bf16.vlgmr.msra.gmra.mrb[0].mxu0 %v306_v25  ;;  %838 = vmatpush3.bf16.msra.mxu1 %v1012_v30 }
 0x1a9   : > { %v808_v31 = vpop.f32.mrb[0].mxu0 }
 0x1aa   : > { %v809_v32 = vpop.f32.mrb[1].mxu0 }
 0x1ab   : > { %v810_v33 = vadd.f32 %v809_v32, %v808_v31  ;;  %v811_v34 = vpop.f32.mrb[2].mxu0 }
 0x1ac   : > { %v812_v35 = vpop.f32.mrb[3].mxu0 }
 0x1ad   : > { %v813_v36 = vadd.f32 %v812_v35, %v811_v34  ;;  %1013 = vtanh.f32 %v810_v33 }
 0x1af   : > { %1015 = vtanh.f32 %v813_v36 }
 0x1b7   : > { %v1014_v37 = vpop.eup %1013 }
 0x1b9   : > { %v1016_v38 = vpop.eup %1015 }
 0x1ba   : > { %v493_v39 = vpack.c.bf16 %v1016_v38, %v1014_v37 }
 0x1bc   : > { %840 = vmatmul.mubr.bf16.vlgmr.msra.gmra.mrb[0].mxu1 %v493_v39 }
 0x28f   : > { %v592_v40 = vpop.f32.mrb[0].mxu1 }
 0x290   : > { %1017 = vtanh.f32 %v592_v40  ;;  %v841_v41 = vpop.f32.mrb[1].mxu1 }
 0x291   : > { %v595_v42 = vpop.f32.mrb[2].mxu1 }
 0x292   : > { %1019 = vtanh.f32 %v595_v42  ;;  %v842_v43 = vpop.f32.mrb[3].mxu1 }
 0x29a   : > { %v1018_v44 = vpop.eup %1017 }
 0x29b   : > { %601 = vst [vmem:[%s288_s24] sm:$0xff] %v1018_v44 }
 0x29c   : > { %v1020_v45 = vpop.eup %1019 }
 0x29d   : > { %602 = vst [vmem:[%s288_s24 + $0x8] sm:$0xff] %v1020_v45 }
 0x29e   : > { %1144 = shalt.err (!%p1141_p12)
}
 0x29f   : > { %s1145_s21 = scalar_lea.hbm %s1652_s28, 256  ;;  %s1149_s29 = scalar_lea.hbm %s1770_s18, 1024 }
 0x2a0   : > { %p1146_p9 = scmp.ne.s32.totalorder %s1652_s28, %s1145_s21  ;;  %p1150_p10 = scmp.lt.u32.totalorder %s1652_s28, %s1770_s18 }
 0x2a1   : > { %p1151_p0 = scmp.lt.u32.totalorder %s1149_s29, %s1145_s21  ;;  %p1153_p13 = scmp.lt.u32.totalorder %s1145_s21, %s1652_s28 }
 0x2a2   : > { %p1147_p1 = pnand %p1146_p9, %p1768_p8 }
 0x2a3   : > { %p1152_p2 = por %p1151_p0, %p1150_p10 }
 0x2a4   : > { %p1148_p7 = pneg %p1147_p1 }
 0x2a5   : > { %p1154_p3 = por %p1153_p13, %p1152_p2 }
 0x2a7   : > { %p1155_p6 = pnand %p1154_p3, %p1148_p7 }
 0x2a9   : > { %1158 = shalt.err (!%p1155_p6)
}
 0x2aa   : > { %s1285_s4 = smov 128   ;;  %s1286_s5 = smov 8  }
 0x2ab   : > { %857 = dma.vmem_to_hbm [thread:$0]  (%p1768_p8), %s1647_s26, 256, %s1652_s28, %s1654_s22, %s1285_s4, %s1285_s4, %s1286_s5  }
 0x2ac PF: > { %p881_p4 = scmp.ge.s32.totalorder %s1271_s17, 2  ;;  %s635_s7 = sand.u32 1, %s1227_s0  }
 0x2ad   : > { %p1771_p11 = scmp.ne.s32.totalorder %s1751_s12, 0  ;;  %s636_s14 = scalar_lea.sflag [#allocation8], %s635_s7 }
 0x2af   : > { %p875_p5 = pnand %p881_p4, %p1771_p11 }
 0x2b1   : > { %1222 = dma.done.wait (!%p875_p5), %s636_s14, 256  }
 0x2b2   : > { %1224 = vsyncadd (!%p875_p5), %s636_s14, 4294967040  ;;  %s30_s17 = sadd.s32 1, %s1271_s17   ;;  %s1772_s2 = sld [smem:[#allocation23_spill]] }
 0x2b3   : > { %p27_p12 = scmp.ge.s32.totalorder %s30_s17, 6   ;;  %s1773_s26 = sld [smem:[#allocation24_spill]] }
 0x2b4   : > { %s1774_s14 = sld [smem:[#allocation27_spill]]  ;;  %s1775_s28 = sld [smem:[#allocation26_spill]] }
 0x2b5   : > { %s1776_s0 = smov %s1231_s1  ;;  %s1777_s1 = smov %s1235_s8 }
 0x2b6   : > { %s1778_s8 = smov %s1512_s15  ;;  %s1779_s9 = smov %s1243_s10 }
 0x2b7   : > { %s1781_s11 = smov %s1793_s25  ;;  %s1782_s12 = smov %s1255_s13 }
 0x2b8   : > { %s1780_s10 = smov %s1772_s2  ;;  %s1784_s15 = smov %s1267_s16 }
 0x2b9   : > { %s1783_s13 = smov %s1773_s26  ;;  %29 = sbr.rel (!%p27_p12) target bundleno = 33 (0x21), region = 101 }
 0x2ba   : > { %s1785_s16 = smov %s1775_s28 }
 0x2c0   :  { %641 = vsyncpa [#allocation7], 1 }
 0x2c1   :  { %643 = vsyncpa [#allocation7 + $0x1], 1 }
 0x2c2   :  { %644 = vsyncpa [#allocation10], 1 }
 0x2c3   :  { %645 = vsyncpa [#allocation8], 1 }
 0x2c4   :  { %647 = vsyncpa [#allocation8 + $0x1], 1 }

</bundles_post_ra>
